<compile_context>
chip_gen: v6e
topology: v6e:2x2x1
jax: 0.10.0
libtpu: 0.0.40
codegen_flags: <defaults>
</compile_context>

<pallas_src>
import math

import jax
import jax.numpy as jnp
from jax.experimental import pallas as pl
from jax.experimental.pallas import tpu as pltpu


def _cerl_mlp_kernel(x_ref, w1_ref, b1_ref, w2_ref, b2_ref, o_ref):
    # hidden = relu(x @ W1 + b1), f32 accumulation on the MXU.
    x = x_ref[...].astype(w1_ref.dtype)           # bf16 cast in-kernel: free VPU work
    h = jnp.dot(x, w1_ref[...], preferred_element_type=jnp.float32)
    h = jnp.maximum(h + b1_ref[...], 0.0)         # f32 bias + ReLU on the VPU
    # out = hidden @ W2 + b2
    out = jnp.dot(h.astype(w2_ref.dtype), w2_ref[...],
                  preferred_element_type=jnp.float32)
    o_ref[...] = (out + b2_ref[...]).astype(o_ref.dtype)


def _round_up(n, m):
    return (n + m - 1) // m * m


def prepare_cerl_mlp_params(w1, b1, w2, b2, *, matmul_dtype=jnp.bfloat16):
    """Once-per-parameter-set preparation (hoisted out of the forward call).

    Casts weights to the MXU operand dtype (bf16 is full rate on v5e/v6e/v7x)
    and reshapes biases to (1, D). Biases stay f32 — the bias/ReLU path
    accumulates in f32 inside the kernel.
    """
    return (w1.astype(matmul_dtype),
            b1.reshape(1, -1).astype(jnp.float32),
            w2.astype(matmul_dtype),
            b2.reshape(1, -1).astype(jnp.float32))


def cerl_mlp_forward(x, params, *, block_b=2048):
    """Forward pass of CerlMlp: relu(x @ w1 + b1) @ w2 + b2.

    x      : (B, obs_size), any float dtype (output dtype follows x)
    params : tuple from prepare_cerl_mlp_params()
    returns (B, n_actions) in x.dtype
    """
    w1, b1, w2, b2 = params
    B, obs = x.shape
    hidden = w1.shape[1]
    n_actions = w2.shape[1]

    # Batch tile: multiple of 8 (sublane), capped at block_b; ragged last tile
    # is handled by the cdiv grid (no wrapper-side batch padding / slicing).
    tile_b = min(block_b, _round_up(B, 8))
    # Give the v7x megacore at least two batch tiles to shard when B allows it.
    if B > 8 and pl.cdiv(B, tile_b) < 2:
        tile_b = _round_up(pl.cdiv(B, 2), 8)
    grid_b = pl.cdiv(B, tile_b)

    return pl.pallas_call(
        _cerl_mlp_kernel,
        out_shape=jax.ShapeDtypeStruct((B, n_actions), x.dtype),
        grid_spec=pltpu.PrefetchScalarGridSpec(
            num_scalar_prefetch=0,
            grid=(grid_b,),
            in_specs=[
                # x: tiled over batch, native obs width (last dim == full dim).
                pl.BlockSpec((tile_b, obs), lambda i: (i, 0)),
                # weights / biases: full blocks, VMEM-resident across the grid.
                pl.BlockSpec((obs, hidden), lambda i: (0, 0)),
                pl.BlockSpec((1, hidden), lambda i: (0, 0)),
                pl.BlockSpec((hidden, n_actions), lambda i: (0, 0)),
                pl.BlockSpec((1, n_actions), lambda i: (0, 0)),
            ],
            out_specs=pl.BlockSpec((tile_b, n_actions), lambda i: (i, 0)),
        ),
        compiler_params=pltpu.CompilerParams(
            # batch tiles are independent -> megacore-shardable on v7x
            dimension_semantics=("parallel",),
        ),
    )(x, w1, b1, w2, b2)


def init_cerl_mlp_params(key, obs_size, hidden_size, n_actions, dtype=jnp.float32):
    """Init matching nn.Linear's default U(-1/sqrt(fan_in), +1/sqrt(fan_in))."""
    k1, k2, k3, k4 = jax.random.split(key, 4)
    bound1 = 1.0 / math.sqrt(obs_size)
    bound2 = 1.0 / math.sqrt(hidden_size)
    w1 = jax.random.uniform(k1, (obs_size, hidden_size), dtype, -bound1, bound1)
    b1 = jax.random.uniform(k2, (hidden_size,), dtype, -bound1, bound1)
    w2 = jax.random.uniform(k3, (hidden_size, n_actions), dtype, -bound2, bound2)
    b2 = jax.random.uniform(k4, (n_actions,), dtype, -bound2, bound2)
    return w1, b1, w2, b2


def _reference(x, w1, b1, w2, b2):
    return jnp.maximum(x @ w1 + b1, 0.0) @ w2 + b2


if __name__ == "__main__":
    obs_size, hidden_size, n_actions = 16, 32, 8

    key = jax.random.PRNGKey(0)
    k_x, k_x2, k_p = jax.random.split(key, 3)
    w1, b1, w2, b2 = init_cerl_mlp_params(k_p, obs_size, hidden_size, n_actions)

    # Parameter prep is hoisted: done once, reused across calls.
    params_f32 = prepare_cerl_mlp_params(w1, b1, w2, b2, matmul_dtype=jnp.float32)
    params_bf16 = prepare_cerl_mlp_params(w1, b1, w2, b2)  # default fast path

    # 1) Small batch (single tile), f32 matmul — tight tolerance.
    x_small = jax.random.normal(k_x, (8, obs_size), jnp.float32)
    out_small = jax.block_until_ready(cerl_mlp_forward(x_small, params_f32))
    ref_small = _reference(x_small, w1, b1, w2, b2)
    assert out_small.shape == (8, n_actions)
    assert jnp.allclose(out_small, ref_small, atol=1e-5, rtol=1e-5)

    # 2) Uneven batch (260 rows, not a multiple of the tile) exercising the
    #    ragged cdiv grid and multi-tile path.
    x_big = jax.random.normal(k_x2, (260, obs_size), jnp.float32)
    out_big = jax.block_until_ready(cerl_mlp_forward(x_big, params_f32, block_b=128))
    ref_big = _reference(x_big, w1, b1, w2, b2)
    assert out_big.shape == (260, n_actions)
    assert jnp.allclose(out_big, ref_big, atol=1e-5, rtol=1e-5)

    # 3) Default bf16 matmul operands (full-rate MXU) — looser tolerance.
    #    Default block_b would fit all 260 rows in one tile, so the wrapper
    #    splits it into two tiles for the v7x megacore.
    out_bf16 = jax.block_until_ready(cerl_mlp_forward(x_big, params_bf16))
    assert out_bf16.shape == (260, n_actions)
    assert jnp.allclose(out_bf16, ref_big, atol=2e-2, rtol=2e-2)

    print("KERNEL_OK")
</pallas_src>

<mosaic_0001>
module attributes {stable_mosaic.version = 11 : i64} {
  func.func @_cerl_mlp_kernel(%arg0: i32, %arg1: memref<8x16xf32, #tpu.memory_space<vmem>>, %arg2: memref<16x32xf32, #tpu.memory_space<vmem>>, %arg3: memref<1x32xf32, #tpu.memory_space<vmem>>, %arg4: memref<32x8xf32, #tpu.memory_space<vmem>>, %arg5: memref<1x8xf32, #tpu.memory_space<vmem>>, %arg6: memref<8x8xf32, #tpu.memory_space<vmem>>) attributes {dimension_semantics = [#tpu.dimension_semantics<parallel>], iteration_bounds = array<i64: 1>, scalar_prefetch = 0 : i64, scratch_operands = 0 : i64, tpu.core_type = #tpu.core_type<tc>, window_params = [{transform_indices = @transform_0, window_bounds = array<i64: 8, 16>}, {pipeline_mode = #tpu.pipeline_mode<synchronous>, transform_indices = @transform_1, window_bounds = array<i64: 16, 32>}, {pipeline_mode = #tpu.pipeline_mode<synchronous>, transform_indices = @transform_2, window_bounds = array<i64: 1, 32>}, {pipeline_mode = #tpu.pipeline_mode<synchronous>, transform_indices = @transform_3, window_bounds = array<i64: 32, 8>}, {pipeline_mode = #tpu.pipeline_mode<synchronous>, transform_indices = @transform_4, window_bounds = array<i64: 1, 8>}, {transform_indices = @transform_5, window_bounds = array<i64: 8, 8>}]} {
    %c0 = arith.constant 0 : index
    %c0_0 = arith.constant 0 : index
    %0 = vector.load %arg1[%c0, %c0_0] : memref<8x16xf32, #tpu.memory_space<vmem>>, vector<8x16xf32>
    %c0_1 = arith.constant 0 : index
    %c0_2 = arith.constant 0 : index
    %1 = vector.load %arg2[%c0_1, %c0_2] : memref<16x32xf32, #tpu.memory_space<vmem>>, vector<16x32xf32>
    %cst = arith.constant dense<0.000000e+00> : vector<8x32xf32>
    %2 = tpu.matmul %0, %1, %cst {dimension_numbers = #tpu.dot_dimension_numbers<[1], [0], [0], [1], [0, 0, 1, 1], [], []>} : vector<8x16xf32>, vector<16x32xf32>, vector<8x32xf32> -> vector<8x32xf32>
    %c0_3 = arith.constant 0 : index
    %c0_4 = arith.constant 0 : index
    %3 = vector.load %arg3[%c0_3, %c0_4] : memref<1x32xf32, #tpu.memory_space<vmem>>, vector<1x32xf32>
    %4 = vector.broadcast %3 : vector<1x32xf32> to vector<8x32xf32>
    %5 = arith.addf %2, %4 : vector<8x32xf32>
    %cst_5 = arith.constant 0.000000e+00 : f32
    %6 = vector.broadcast %cst_5 : f32 to vector<8x32xf32>
    %7 = arith.maximumf %5, %6 : vector<8x32xf32>
    %c0_6 = arith.constant 0 : index
    %c0_7 = arith.constant 0 : index
    %8 = vector.load %arg4[%c0_6, %c0_7] : memref<32x8xf32, #tpu.memory_space<vmem>>, vector<32x8xf32>
    %cst_8 = arith.constant dense<0.000000e+00> : vector<8x8xf32>
    %9 = tpu.matmul %7, %8, %cst_8 {dimension_numbers = #tpu.dot_dimension_numbers<[1], [0], [0], [1], [0, 0, 1, 1], [], []>} : vector<8x32xf32>, vector<32x8xf32>, vector<8x8xf32> -> vector<8x8xf32>
    %c0_9 = arith.constant 0 : index
    %c0_10 = arith.constant 0 : index
    %10 = vector.load %arg5[%c0_9, %c0_10] : memref<1x8xf32, #tpu.memory_space<vmem>>, vector<1x8xf32>
    %11 = vector.broadcast %10 : vector<1x8xf32> to vector<8x8xf32>
    %12 = arith.addf %9, %11 : vector<8x8xf32>
    %c0_11 = arith.constant 0 : index
    %c0_12 = arith.constant 0 : index
    %13 = vector.load %arg6[%c0_11, %c0_12] : memref<8x8xf32, #tpu.memory_space<vmem>>, vector<8x8xf32>
    tpu.vector_store %arg6[%c0_11, %c0_12], %12 {strides = array<i32>} : memref<8x8xf32, #tpu.memory_space<vmem>>, vector<8x8xf32>,
    return
  }
  func.func @transform_0(%arg0: i32) -> (i32, i32) {
    %c0_i32 = arith.constant 0 : i32
    %c0_i32_0 = arith.constant 0 : i32
    return %arg0, %c0_i32 : i32, i32
  }
  func.func @transform_1(%arg0: i32) -> (i32, i32) {
    %c0_i32 = arith.constant 0 : i32
    %c0_i32_0 = arith.constant 0 : i32
    %c0_i32_1 = arith.constant 0 : i32
    return %c0_i32, %c0_i32_0 : i32, i32
  }
  func.func @transform_2(%arg0: i32) -> (i32, i32) {
    %c0_i32 = arith.constant 0 : i32
    %c0_i32_0 = arith.constant 0 : i32
    %c0_i32_1 = arith.constant 0 : i32
    return %c0_i32, %c0_i32_0 : i32, i32
  }
  func.func @transform_3(%arg0: i32) -> (i32, i32) {
    %c0_i32 = arith.constant 0 : i32
    %c0_i32_0 = arith.constant 0 : i32
    %c0_i32_1 = arith.constant 0 : i32
    return %c0_i32, %c0_i32_0 : i32, i32
  }
  func.func @transform_4(%arg0: i32) -> (i32, i32) {
    %c0_i32 = arith.constant 0 : i32
    %c0_i32_0 = arith.constant 0 : i32
    %c0_i32_1 = arith.constant 0 : i32
    return %c0_i32, %c0_i32_0 : i32, i32
  }
  func.func @transform_5(%arg0: i32) -> (i32, i32) {
    %c0_i32 = arith.constant 0 : i32
    %c0_i32_0 = arith.constant 0 : i32
    return %arg0, %c0_i32 : i32, i32
  }
}

</mosaic_0001>

<bundles_post_ra>
// kernel: tpu_custom_call.1
= control target key start
LH: loop header
LB: loop body
LE: loop exit
PB: predicated region body
PF: predicated region fallthrough
CT: control target
= control target key end

     0   :  { %v262_v1 = vmov 0.0   ;;  %vm263_vm0 = vmmov 0   ;;  %s325_s0 = inlined_call_operand.vmem [shape: f32[8,16], index: 0, kind: input, shape index: {}]   ;;  %s326_s1 = inlined_call_operand.vmem [shape: f32[16,32], index: 1, kind: input, shape index: {}]   ;;  %s327_s2 = inlined_call_operand.vmem [shape: f32[1,32], index: 2, kind: input, shape index: {}]   ;;  %s328_s3 = inlined_call_operand.vmem [shape: f32[32,8], index: 3, kind: input, shape index: {}]   ;;  %s329_s4 = inlined_call_operand.vmem [shape: f32[1,8], index: 4, kind: input, shape index: {}]   ;;  %s330_s5 = inlined_call_operand.hbm [shape: f32[8,8], index: 5, kind: output, shape index: {}]  }
   0x1   :  { %v23_v0 = vld [vmem:[%s326_s1 + $0x8] sm:$0xff]  ;;  %219 = vmatprep.subr.mxu0 %v262_v1  ;;  %v22_v2 = vld [vmem:[%s326_s1] sm:$0xff]  ;;  %223 = vmatprep.mubr.msk.f32.mxu0 %vm263_vm0, %v262_v1  ;;  %v109_v3 = vld [vmem:[%s328_s3 + $0x18] sm:$0xff] }
   0x2   :  { %10 = vsyncpa [#allocation3], 0  ;;  %220 = vmatpush3.msra.mxu0 %v23_v0  ;;  %v21_v4 = vld [vmem:[%s325_s0] sm:$0xff]  ;;  %vm31_vm1 = vcmask 130048   ;;  %226 = vmatprep.subr.mxu1 %v262_v1  ;;  %v108_v5 = vld [vmem:[%s328_s3 + $0x10] sm:$0xff]  ;;  %vm117_vm2 = vcmask 261120  }
   0x3   :  { %221 = vmatprep.subr.mxu0 %v262_v1  ;;  %227 = vmatpush3.msra.mxu1 %v109_v3  ;;  %v107_v6 = vld [vmem:[%s328_s3 + $0x8] sm:$0xff]  ;;  %v106_v7 = vld [vmem:[%s328_s3] sm:$0xff]  ;;  %s264_s9 = smov [#allocation2]   ;;  %vm191_vm3 = vcmask 64512  }
   0x4   :  { %222 = vmatpush3.msra.mxu0 %v22_v2  ;;  %228 = vmatprep.subr.mxu1 %v262_v1  ;;  %v207_v8 = vld [vmem:[%s327_s2] ss:$0 sm:$0xff]  ;;  %s199_s10 = sshll.u32 %s264_s9, 4  ;;  %s200_s10 = int_to_ptr.vmem [resolvable:$true] %s199_s10 }
   0x5   :  { %224 = vmatmul.mubr.msk.f32.vlgmr.msra.gmra.mxu0 %vm31_vm1, %v21_v4  ;;  %234 = vmatprep.mubr.msk.f32.mxu1 %vm263_vm0, %v262_v1  ;;  %v209_v13 = vld [vmem:[%s329_s4] ss:$0 sm:$0xff]  ;;  %s240_s3 = scalar_lea.vmem %s200_s10, 128  ;;  %p245_p1 = scmp.lt.s32.totalorder %s200_s10, %s200_s10 }
   0x6   :  { %229 = vmatpush3.msra.mxu1 %v108_v5  ;;  %p241_p0 = scmp.ne.s32.totalorder %s200_s10, %s240_s3  ;;  %p246_p2 = scmp.lt.s32.totalorder %s240_s3, %s240_s3 }
   0x7   :  { %230 = vmatprep.subr.mxu1 %v262_v1 }
   0x8   :  { %231 = vmatpush3.msra.mxu1 %v107_v6  ;;  %p247_p3 = por %p246_p2, %p245_p1 }
   0x9   :  { %232 = vmatprep.subr.mxu1 %v262_v1 }
   0xa   :  { %233 = vmatpush3.msra.mxu1 %v106_v7  ;;  %p248_p4 = pnand %p247_p3, %p241_p0 }
  0xc5   :  { %v101_v9 = vpop.f32.mrf.mxu0 }
  0xc6   :  { %v102_v10 = vadd.f32 %v207_v8, %v101_v9 }
  0xc7   :  { %v225_v11 = vpop.f32.mrf.mxu0 }
  0xc8   :  { %v105_v12 = vmax.f32 %v102_v10, 0.0 }
  0xca   :  { %235 = vmatmul.mubr.msk.f32.vlgmr.msra.gmra.mxu1 %vm117_vm2, %v105_v12 }
 0x18a   :  { %v187_v14 = vpop.f32.mrf.mxu1 }
 0x18b   :  { %v188_v15 = vadd.f32 %v209_v13, %v187_v14 }
 0x18c   :  { %v236_v16 = vpop.f32.mrf.mxu1 }
 0x18d   :  { %192 = vst.msk [vmem:[#allocation2] sm:$0xff] %vm191_vm3, %v188_v15 }
 0x18e   :  { %251 = shalt.err (!%p248_p4)
}
 0x18f   :  { %202 = dma.vmem_to_hbm [thread:$0]  %s200_s10, 128, %s330_s5, [#allocation3]  }
 0x190   :  { %260 = dma.done.wait [#allocation3], 128  }
 0x191   :  { %261 = vsyncadd [#allocation3], 4294967168 }
 0x192   :  { %206 = vsyncpa [#allocation3], 1 }

</bundles_post_ra>
